<compile_context>
chip_gen: v6e
topology: v6e:2x2x1
jax: 0.10.0
libtpu: 0.0.40
codegen_flags: <defaults>
</compile_context>

<pallas_src>
import math
from functools import partial

import jax
import jax.numpy as jnp
from jax.experimental import pallas as pl
from jax.experimental.pallas import tpu as pltpu

EPS = 0.003


def _round_up(x, m):
    return ((x + m - 1) // m) * m


def _tpu_num_tensorcores():
    """2 on v7x (megacore split worth it), else 1."""
    try:
        kind = jax.devices()[0].device_kind.lower()
    except Exception:
        return 1
    if "v7" in kind or "7x" in kind:
        return 2
    return 1


def _pick_tb(batch, num_cores):
    """Batch tile: single tile for small batches, >=2 grid steps on v7x,
    capped at 1024 rows per step (sweep-informed; keeps VMEM well inside
    limits and makes per-step overhead ~10% of per-step MXU work)."""
    pb8 = _round_up(max(batch, 1), 8)
    if num_cores >= 2 and batch > 8:
        tb = _round_up(pl.cdiv(pb8, 2), 8)   # grid >= 2 -> both TensorCores busy
    else:
        tb = pb8                              # single grid step if it fits
    return min(tb, 1024)


def _actor_kernel(alim_ref,
                  x_ref,
                  w1_ref, b1_ref,
                  w2_ref, b2_ref,
                  w3_ref, b3_ref,
                  w4_ref, b4_ref,
                  out_ref):
    """One batch tile: fc1->relu->fc2->relu->fc3->relu->fc4->tanh->*action_lim."""
    action_lim = alim_ref[0, 0]

    x = x_ref[...]  # already bf16 (cast fused into the wrapper pad)

    h1 = jnp.dot(x, w1_ref[...], preferred_element_type=jnp.float32) + b1_ref[...]
    h1 = jnp.maximum(h1, 0.0).astype(jnp.bfloat16)

    h2 = jnp.dot(h1, w2_ref[...], preferred_element_type=jnp.float32) + b2_ref[...]
    h2 = jnp.maximum(h2, 0.0).astype(jnp.bfloat16)

    h3 = jnp.dot(h2, w3_ref[...], preferred_element_type=jnp.float32) + b3_ref[...]
    h3 = jnp.maximum(h3, 0.0).astype(jnp.bfloat16)

    logits = jnp.dot(h3, w4_ref[...], preferred_element_type=jnp.float32) + b4_ref[...]
    out_ref[...] = (jnp.tanh(logits) * action_lim).astype(out_ref.dtype)


@partial(jax.jit, static_argnames=("action_size", "state_size"))
def _actor_forward_impl(state, w1, b1, w2, b2, w3, b3, w4, b4,
                        action_lim, *, action_size, state_size):
    batch = state.shape[0]
    s_pad = w1.shape[0]
    a_pad = w4.shape[1]

    num_cores = _tpu_num_tensorcores()
    tb = _pick_tb(batch, num_cores)
    padded_batch = _round_up(batch, tb)
    grid = (padded_batch // tb,)

    # One fused pad + bf16 cast: zero feature padding (required — padded lanes
    # must be exact zeros against the zero-padded weight rows), batch rounded
    # up to the tile size (a handful of zero rows; no separate f32 copy).
    x = jnp.pad(state.astype(jnp.bfloat16),
                ((0, padded_batch - batch), (0, s_pad - state_size)))

    alim = jnp.asarray(action_lim, jnp.float32).reshape(1, 1)

    def const_spec(arr):
        # Full array, same block every grid step -> stays VMEM-resident.
        return pl.BlockSpec(arr.shape, lambda i: (0, 0))

    in_specs = [
        pl.BlockSpec(memory_space=pltpu.MemorySpace.SMEM),   # action_lim scalar
        pl.BlockSpec((tb, s_pad), lambda i: (i, 0)),         # state tile (bf16)
        const_spec(w1), const_spec(b1),
        const_spec(w2), const_spec(b2),
        const_spec(w3), const_spec(b3),
        const_spec(w4), const_spec(b4),
    ]
    out_spec = pl.BlockSpec((tb, a_pad), lambda i: (i, 0))

    out_padded = pl.pallas_call(
        _actor_kernel,
        out_shape=jax.ShapeDtypeStruct((padded_batch, a_pad), jnp.float32),
        grid=grid,
        in_specs=in_specs,
        out_specs=out_spec,
        compiler_params=pltpu.CompilerParams(
            dimension_semantics=("parallel",),
            vmem_limit_bytes=32 * 1024 * 1024,
        ),
    )(alim, x, w1, b1, w2, b2, w3, b3, w4, b4)

    return out_padded[:batch, :action_size]


def actor_forward(state, params, action_lim):
    """state: (batch, state_size) f32. Returns (batch, action_size) f32 actions,
    matching PyTorch Actor.forward (up to bf16 matmul rounding)."""
    state_size = state.shape[1]
    return _actor_forward_impl(
        state,
        params["w1"], params["b1"],
        params["w2"], params["b2"],
        params["w3"], params["b3"],
        params["w4"], params["b4"],
        action_lim,
        action_size=params["action_size"],
        state_size=state_size,
    )


# ----------------------------- init (mirrors PyTorch) -----------------------

def fanin_init(key, shape, fanin=None):
    """Uniform(-1/sqrt(fanin), 1/sqrt(fanin)); mirrors the reference helper.
    `shape` is (in_features, out_features) (transposed storage for x @ W);
    PyTorch's fanin = weight.size(0) = out_features -> shape[1] here."""
    fanin = fanin or shape[1]
    v = 1.0 / math.sqrt(fanin)
    return jax.random.uniform(key, shape, jnp.float32, minval=-v, maxval=v)


def _pad2(a, rows, cols):
    out = jnp.zeros((rows, cols), a.dtype)
    return out.at[:a.shape[0], :a.shape[1]].set(a)


def init_actor_params(key, state_size, action_size,
                      hidden1=500, hidden2=400, hidden3=200):
    """Initialize like the PyTorch Actor, then zero-pad to (8,128)-aligned
    shapes; weights bf16, biases f32."""
    ks = jax.random.split(key, 8)

    def bias_init(k, in_features, out_features):
        # nn.Linear default bias init: U(-1/sqrt(in_features), 1/sqrt(in_features))
        bound = 1.0 / math.sqrt(in_features)
        return jax.random.uniform(k, (1, out_features), jnp.float32,
                                  minval=-bound, maxval=bound)

    # Logical (un-padded) parameters, stored transposed as (in, out).
    w1 = fanin_init(ks[0], (state_size, hidden1))
    b1 = bias_init(ks[1], state_size, hidden1)
    w2 = fanin_init(ks[2], (hidden1, hidden2))
    b2 = bias_init(ks[3], hidden1, hidden2)
    w3 = fanin_init(ks[4], (hidden2, hidden3))
    b3 = bias_init(ks[5], hidden2, hidden3)
    w4 = jax.random.uniform(ks[6], (hidden3, action_size), jnp.float32,
                            minval=-EPS, maxval=EPS)
    b4 = bias_init(ks[7], hidden3, action_size)

    s_pad = _round_up(state_size, 128)
    h1_pad = _round_up(hidden1, 128)   # 500 -> 512
    h2_pad = _round_up(hidden2, 128)   # 400 -> 512
    h3_pad = _round_up(hidden3, 128)   # 200 -> 256
    a_pad = _round_up(action_size, 128)

    return {
        "w1": _pad2(w1, s_pad, h1_pad).astype(jnp.bfloat16),
        "b1": _pad2(b1, 1, h1_pad),
        "w2": _pad2(w2, h1_pad, h2_pad).astype(jnp.bfloat16),
        "b2": _pad2(b2, 1, h2_pad),
        "w3": _pad2(w3, h2_pad, h3_pad).astype(jnp.bfloat16),
        "b3": _pad2(b3, 1, h3_pad),
        "w4": _pad2(w4, h3_pad, a_pad).astype(jnp.bfloat16),
        "b4": _pad2(b4, 1, a_pad),
        "action_size": action_size,
    }


def _reference_forward(state, params, action_lim):
    """Pure-JAX reference using the same (bf16-rounded) padded weights."""
    x = state
    s = params["w1"].shape[0]
    x = jnp.pad(x, ((0, 0), (0, s - x.shape[1])))
    h = jnp.maximum(x @ params["w1"].astype(jnp.float32) + params["b1"], 0.0)
    h = jnp.maximum(h @ params["w2"].astype(jnp.float32) + params["b2"], 0.0)
    h = jnp.maximum(h @ params["w3"].astype(jnp.float32) + params["b3"], 0.0)
    a = jnp.tanh(h @ params["w4"].astype(jnp.float32) + params["b4"]) * action_lim
    return a[:, :params["action_size"]]


if __name__ == "__main__":
    key = jax.random.PRNGKey(0)
    k_params, k_state1, k_state2 = jax.random.split(key, 3)

    state_size = 32
    action_size = 8
    action_lim = 2.0

    params = init_actor_params(k_params, state_size, action_size)

    # Small batch (as in typical RL action selection).
    state = jax.random.normal(k_state1, (2, state_size), jnp.float32)
    action = actor_forward(state, params, action_lim)
    jax.block_until_ready(action)

    assert action.shape == (2, action_size)
    assert bool(jnp.all(jnp.isfinite(action)))
    assert bool(jnp.all(jnp.abs(action) <= action_lim + 1e-5))
    ref = _reference_forward(state, params, action_lim)
    assert bool(jnp.allclose(action, ref, atol=5e-2)), "mismatch vs reference"

    # Slightly larger batch exercises batch-tile padding / multi-step grid.
    state2 = jax.random.normal(k_state2, (24, state_size), jnp.float32)
    action2 = actor_forward(state2, params, action_lim)
    jax.block_until_ready(action2)
    assert action2.shape == (24, action_size)
    assert bool(jnp.all(jnp.abs(action2) <= action_lim + 1e-5))
    ref2 = _reference_forward(state2, params, action_lim)
    assert bool(jnp.allclose(action2, ref2, atol=5e-2)), "mismatch vs reference"

    print("KERNEL_OK")
</pallas_src>

<mosaic_0001>
module attributes {stable_mosaic.version = 11 : i64} {
  func.func @_actor_kernel(%arg0: i32, %arg1: memref<1x1xf32, #tpu.memory_space<smem>>, %arg2: memref<8x128xbf16, #tpu.memory_space<vmem>>, %arg3: memref<128x512xbf16, #tpu.memory_space<vmem>>, %arg4: memref<1x512xf32, #tpu.memory_space<vmem>>, %arg5: memref<512x512xbf16, #tpu.memory_space<vmem>>, %arg6: memref<1x512xf32, #tpu.memory_space<vmem>>, %arg7: memref<512x256xbf16, #tpu.memory_space<vmem>>, %arg8: memref<1x256xf32, #tpu.memory_space<vmem>>, %arg9: memref<256x128xbf16, #tpu.memory_space<vmem>>, %arg10: memref<1x128xf32, #tpu.memory_space<vmem>>, %arg11: memref<8x128xf32, #tpu.memory_space<vmem>>) attributes {dimension_semantics = [#tpu.dimension_semantics<parallel>], iteration_bounds = array<i64: 1>, scalar_prefetch = 0 : i64, scratch_operands = 0 : i64, tpu.core_type = #tpu.core_type<tc>, window_params = [{transform_indices = @transform_0, window_bounds = array<i64: 1, 1>}, {transform_indices = @transform_1, window_bounds = array<i64: 8, 128>}, {pipeline_mode = #tpu.pipeline_mode<synchronous>, transform_indices = @transform_2, window_bounds = array<i64: 128, 512>}, {pipeline_mode = #tpu.pipeline_mode<synchronous>, transform_indices = @transform_3, window_bounds = array<i64: 1, 512>}, {pipeline_mode = #tpu.pipeline_mode<synchronous>, transform_indices = @transform_4, window_bounds = array<i64: 512, 512>}, {pipeline_mode = #tpu.pipeline_mode<synchronous>, transform_indices = @transform_5, window_bounds = array<i64: 1, 512>}, {pipeline_mode = #tpu.pipeline_mode<synchronous>, transform_indices = @transform_6, window_bounds = array<i64: 512, 256>}, {pipeline_mode = #tpu.pipeline_mode<synchronous>, transform_indices = @transform_7, window_bounds = array<i64: 1, 256>}, {pipeline_mode = #tpu.pipeline_mode<synchronous>, transform_indices = @transform_8, window_bounds = array<i64: 256, 128>}, {pipeline_mode = #tpu.pipeline_mode<synchronous>, transform_indices = @transform_9, window_bounds = array<i64: 1, 128>}, {transform_indices = @transform_10, window_bounds = array<i64: 8, 128>}]} {
    %c0 = arith.constant 0 : index
    %c0_0 = arith.constant 0 : index
    %0 = memref.load %arg1[%c0, %c0_0] : memref<1x1xf32, #tpu.memory_space<smem>>
    %c0_1 = arith.constant 0 : index
    %c0_2 = arith.constant 0 : index
    %1 = vector.load %arg2[%c0_1, %c0_2] : memref<8x128xbf16, #tpu.memory_space<vmem>>, vector<8x128xbf16>
    %c0_3 = arith.constant 0 : index
    %c0_4 = arith.constant 0 : index
    %2 = vector.load %arg3[%c0_3, %c0_4] : memref<128x512xbf16, #tpu.memory_space<vmem>>, vector<128x512xbf16>
    %cst = arith.constant dense<0.000000e+00> : vector<8x512xf32>
    %3 = tpu.matmul %1, %2, %cst {dimension_numbers = #tpu.dot_dimension_numbers<[1], [0], [0], [1], [0, 0, 1, 1], [], []>} : vector<8x128xbf16>, vector<128x512xbf16>, vector<8x512xf32> -> vector<8x512xf32>
    %c0_5 = arith.constant 0 : index
    %c0_6 = arith.constant 0 : index
    %4 = vector.load %arg4[%c0_5, %c0_6] : memref<1x512xf32, #tpu.memory_space<vmem>>, vector<1x512xf32>
    %5 = vector.broadcast %4 : vector<1x512xf32> to vector<8x512xf32>
    %6 = arith.addf %3, %5 : vector<8x512xf32>
    %cst_7 = arith.constant 0.000000e+00 : f32
    %7 = vector.broadcast %cst_7 : f32 to vector<8x512xf32>
    %8 = arith.maximumf %6, %7 : vector<8x512xf32>
    %9 = arith.truncf %8 : vector<8x512xf32> to vector<8x512xbf16>
    %c0_8 = arith.constant 0 : index
    %c0_9 = arith.constant 0 : index
    %10 = vector.load %arg5[%c0_8, %c0_9] : memref<512x512xbf16, #tpu.memory_space<vmem>>, vector<512x512xbf16>
    %cst_10 = arith.constant dense<0.000000e+00> : vector<8x512xf32>
    %11 = tpu.matmul %9, %10, %cst_10 {dimension_numbers = #tpu.dot_dimension_numbers<[1], [0], [0], [1], [0, 0, 1, 1], [], []>} : vector<8x512xbf16>, vector<512x512xbf16>, vector<8x512xf32> -> vector<8x512xf32>
    %c0_11 = arith.constant 0 : index
    %c0_12 = arith.constant 0 : index
    %12 = vector.load %arg6[%c0_11, %c0_12] : memref<1x512xf32, #tpu.memory_space<vmem>>, vector<1x512xf32>
    %13 = vector.broadcast %12 : vector<1x512xf32> to vector<8x512xf32>
    %14 = arith.addf %11, %13 : vector<8x512xf32>
    %cst_13 = arith.constant 0.000000e+00 : f32
    %15 = vector.broadcast %cst_13 : f32 to vector<8x512xf32>
    %16 = arith.maximumf %14, %15 : vector<8x512xf32>
    %17 = arith.truncf %16 : vector<8x512xf32> to vector<8x512xbf16>
    %c0_14 = arith.constant 0 : index
    %c0_15 = arith.constant 0 : index
    %18 = vector.load %arg7[%c0_14, %c0_15] : memref<512x256xbf16, #tpu.memory_space<vmem>>, vector<512x256xbf16>
    %cst_16 = arith.constant dense<0.000000e+00> : vector<8x256xf32>
    %19 = tpu.matmul %17, %18, %cst_16 {dimension_numbers = #tpu.dot_dimension_numbers<[1], [0], [0], [1], [0, 0, 1, 1], [], []>} : vector<8x512xbf16>, vector<512x256xbf16>, vector<8x256xf32> -> vector<8x256xf32>
    %c0_17 = arith.constant 0 : index
    %c0_18 = arith.constant 0 : index
    %20 = vector.load %arg8[%c0_17, %c0_18] : memref<1x256xf32, #tpu.memory_space<vmem>>, vector<1x256xf32>
    %21 = vector.broadcast %20 : vector<1x256xf32> to vector<8x256xf32>
    %22 = arith.addf %19, %21 : vector<8x256xf32>
    %cst_19 = arith.constant 0.000000e+00 : f32
    %23 = vector.broadcast %cst_19 : f32 to vector<8x256xf32>
    %24 = arith.maximumf %22, %23 : vector<8x256xf32>
    %25 = arith.truncf %24 : vector<8x256xf32> to vector<8x256xbf16>
    %c0_20 = arith.constant 0 : index
    %c0_21 = arith.constant 0 : index
    %26 = vector.load %arg9[%c0_20, %c0_21] : memref<256x128xbf16, #tpu.memory_space<vmem>>, vector<256x128xbf16>
    %cst_22 = arith.constant dense<0.000000e+00> : vector<8x128xf32>
    %27 = tpu.matmul %25, %26, %cst_22 {dimension_numbers = #tpu.dot_dimension_numbers<[1], [0], [0], [1], [0, 0, 1, 1], [], []>} : vector<8x256xbf16>, vector<256x128xbf16>, vector<8x128xf32> -> vector<8x128xf32>
    %c0_23 = arith.constant 0 : index
    %c0_24 = arith.constant 0 : index
    %28 = vector.load %arg10[%c0_23, %c0_24] : memref<1x128xf32, #tpu.memory_space<vmem>>, vector<1x128xf32>
    %29 = vector.broadcast %28 : vector<1x128xf32> to vector<8x128xf32>
    %30 = arith.addf %27, %29 : vector<8x128xf32>
    %31 = math.tanh %30 : vector<8x128xf32>
    %32 = vector.broadcast %0 : f32 to vector<8x128xf32>
    %33 = arith.mulf %31, %32 : vector<8x128xf32>
    %c0_25 = arith.constant 0 : index
    %c0_26 = arith.constant 0 : index
    %34 = vector.load %arg11[%c0_25, %c0_26] : memref<8x128xf32, #tpu.memory_space<vmem>>, vector<8x128xf32>
    tpu.vector_store %arg11[%c0_25, %c0_26], %33 {strides = array<i32>} : memref<8x128xf32, #tpu.memory_space<vmem>>, vector<8x128xf32>,
    return
  }
  func.func @transform_0(%arg0: i32) -> (i32, i32) {
    %c0_i32 = arith.constant 0 : i32
    %c0_i32_0 = arith.constant 0 : i32
    %c0_i32_1 = arith.constant 0 : i32
    return %c0_i32, %c0_i32_0 : i32, i32
  }
  func.func @transform_1(%arg0: i32) -> (i32, i32) {
    %c0_i32 = arith.constant 0 : i32
    %c0_i32_0 = arith.constant 0 : i32
    return %arg0, %c0_i32 : i32, i32
  }
  func.func @transform_2(%arg0: i32) -> (i32, i32) {
    %c0_i32 = arith.constant 0 : i32
    %c0_i32_0 = arith.constant 0 : i32
    %c0_i32_1 = arith.constant 0 : i32
    return %c0_i32, %c0_i32_0 : i32, i32
  }
  func.func @transform_3(%arg0: i32) -> (i32, i32) {
    %c0_i32 = arith.constant 0 : i32
    %c0_i32_0 = arith.constant 0 : i32
    %c0_i32_1 = arith.constant 0 : i32
    return %c0_i32, %c0_i32_0 : i32, i32
  }
  func.func @transform_4(%arg0: i32) -> (i32, i32) {
    %c0_i32 = arith.constant 0 : i32
    %c0_i32_0 = arith.constant 0 : i32
    %c0_i32_1 = arith.constant 0 : i32
    return %c0_i32, %c0_i32_0 : i32, i32
  }
  func.func @transform_5(%arg0: i32) -> (i32, i32) {
    %c0_i32 = arith.constant 0 : i32
    %c0_i32_0 = arith.constant 0 : i32
    %c0_i32_1 = arith.constant 0 : i32
    return %c0_i32, %c0_i32_0 : i32, i32
  }
  func.func @transform_6(%arg0: i32) -> (i32, i32) {
    %c0_i32 = arith.constant 0 : i32
    %c0_i32_0 = arith.constant 0 : i32
    %c0_i32_1 = arith.constant 0 : i32
    return %c0_i32, %c0_i32_0 : i32, i32
  }
  func.func @transform_7(%arg0: i32) -> (i32, i32) {
    %c0_i32 = arith.constant 0 : i32
    %c0_i32_0 = arith.constant 0 : i32
    %c0_i32_1 = arith.constant 0 : i32
    return %c0_i32, %c0_i32_0 : i32, i32
  }
  func.func @transform_8(%arg0: i32) -> (i32, i32) {
    %c0_i32 = arith.constant 0 : i32
    %c0_i32_0 = arith.constant 0 : i32
    %c0_i32_1 = arith.constant 0 : i32
    return %c0_i32, %c0_i32_0 : i32, i32
  }
  func.func @transform_9(%arg0: i32) -> (i32, i32) {
    %c0_i32 = arith.constant 0 : i32
    %c0_i32_0 = arith.constant 0 : i32
    %c0_i32_1 = arith.constant 0 : i32
    return %c0_i32, %c0_i32_0 : i32, i32
  }
  func.func @transform_10(%arg0: i32) -> (i32, i32) {
    %c0_i32 = arith.constant 0 : i32
    %c0_i32_0 = arith.constant 0 : i32
    return %arg0, %c0_i32 : i32, i32
  }
}

</mosaic_0001>

<bundles_post_ra>
// kernel: _actor_forward_impl.1
= control target key start
LH: loop header
LB: loop body
LE: loop exit
PB: predicated region body
PF: predicated region fallthrough
CT: control target
= control target key end

     0   :  { %16 = vsyncpa [#allocation4], 0  ;;  %s2873_s0 = inlined_call_operand.<no memory space> [shape: f32[1,1], index: 0, kind: input, shape index: {}]   ;;  %s2874_s1 = inlined_call_operand.vmem [shape: bf16[8,128], index: 1, kind: input, shape index: {}]   ;;  %s2875_s2 = inlined_call_operand.hbm [shape: bf16[128,512], index: 2, kind: input, shape index: {}]   ;;  %s2876_s3 = inlined_call_operand.vmem [shape: f32[1,512], index: 3, kind: input, shape index: {}]   ;;  %s2877_s4 = inlined_call_operand.hbm [shape: bf16[512,512], index: 4, kind: input, shape index: {}]   ;;  %s2878_s5 = inlined_call_operand.vmem [shape: f32[1,512], index: 5, kind: input, shape index: {}]   ;;  %s2879_s6 = inlined_call_operand.hbm [shape: bf16[512,256], index: 6, kind: input, shape index: {}]   ;;  %s2880_s7 = inlined_call_operand.vmem [shape: f32[1,256], index: 7, kind: input, shape index: {}]   ;;  %s2881_s8 = inlined_call_operand.hbm [shape: bf16[256,128], index: 8, kind: input, shape index: {}]   ;;  %s2882_s9 = inlined_call_operand.vmem [shape: f32[1,128], index: 9, kind: input, shape index: {}]   ;;  %s2883_s10 = inlined_call_operand.vmem [shape: f32[8,128], index: 10, kind: output, shape index: {}]  }
   0x1   :  { %17 = vsyncpa [#allocation6], 0 }
   0x2   :  { %18 = vsyncpa [#allocation9], 0  ;;  %s2742_s13 = smov [#allocation5]   ;;  %s2743_s15 = smov [#allocation3]  }
   0x3   :  { %s42_s14 = sshll.u32 %s2742_s13, 4  ;;  %s28_s16 = sshll.u32 %s2743_s15, 4  ;;  %s43_s14 = int_to_ptr.vmem [resolvable:$true] %s42_s14  ;;  %s29_s16 = int_to_ptr.vmem [resolvable:$true] %s28_s16 }
   0x4   :  { %s2664_s17 = scalar_lea.vmem %s43_s14, 16384  ;;  %p2669_p1 = scmp.lt.s32.totalorder %s43_s14, %s43_s14 }
   0x5   :  { %p2665_p0 = scmp.ne.s32.totalorder %s43_s14, %s2664_s17  ;;  %p2670_p2 = scmp.lt.s32.totalorder %s2664_s17, %s2664_s17 }
   0x7   :  { %p2671_p3 = por %p2670_p2, %p2669_p1 }
   0x9   :  { %p2672_p4 = pnand %p2671_p3, %p2665_p0 }
   0xb   :  { %2675 = shalt.err (!%p2672_p4)
}
   0xc   :  { %s2744_s18 = smov 256   ;;  %s2745_s19 = smov 16  }
   0xd   :  { %48 = dma.hbm_to_vmem [thread:$0]  %s2877_s4, 16384, %s43_s14, [#allocation6], %s2744_s18, %s2744_s18, %s2745_s19  }
   0xe   :  { %s2684_s22 = scalar_lea.vmem %s29_s16, 4096  ;;  %p2689_p6 = scmp.lt.s32.totalorder %s29_s16, %s29_s16 }
   0xf   :  { %p2685_p5 = scmp.ne.s32.totalorder %s29_s16, %s2684_s22  ;;  %p2690_p7 = scmp.lt.s32.totalorder %s2684_s22, %s2684_s22 }
  0x11   :  { %p2691_p8 = por %p2690_p7, %p2689_p6 }
  0x13   :  { %p2692_p9 = pnand %p2691_p8, %p2685_p5 }
  0x15   :  { %2695 = shalt.err (!%p2692_p9)
}
  0x16   :  { %34 = dma.hbm_to_vmem [thread:$0]  %s2875_s2, 4096, %s29_s16, [#allocation4], %s2744_s18, %s2744_s18, %s2745_s19  }
  0x17   :  { %s2746_s25 = smov [#allocation7]  }
  0x18   :  { %s56_s26 = sshll.u32 %s2746_s25, 4  ;;  %s57_s26 = int_to_ptr.vmem [resolvable:$true] %s56_s26 }
  0x19   :  { %s2704_s27 = scalar_lea.vmem %s57_s26, 8192  ;;  %p2709_p11 = scmp.lt.s32.totalorder %s57_s26, %s57_s26 }
  0x1a   :  { %p2705_p10 = scmp.ne.s32.totalorder %s57_s26, %s2704_s27  ;;  %p2710_p12 = scmp.lt.s32.totalorder %s2704_s27, %s2704_s27 }
  0x1c   :  { %p2711_p13 = por %p2710_p12, %p2709_p11 }
  0x1e   :  { %p2712_p0 = pnand %p2711_p13, %p2705_p10 }
  0x20   :  { %2715 = shalt.err (!%p2712_p0)
}
  0x21   :  { %s2747_s4 = smov 128   ;;  %s2748_s28 = smov 8  }
  0x22   :  { %62 = dma.hbm_to_vmem [thread:$0]  %s2879_s6, 8192, %s57_s26, [#allocation6], %s2747_s4, %s2747_s4, %s2748_s28  }
  0x23   :  { %s2749_s11 = smov [#allocation8]  }
  0x24   :  { %s70_s12 = sshll.u32 %s2749_s11, 4  ;;  %s71_s12 = int_to_ptr.vmem [resolvable:$true] %s70_s12 }
  0x25   :  { %s2724_s2 = scalar_lea.vmem %s71_s12, 2048  ;;  %p2729_p2 = scmp.lt.s32.totalorder %s71_s12, %s71_s12 }
  0x26   :  { %p2725_p1 = scmp.ne.s32.totalorder %s71_s12, %s2724_s2  ;;  %p2730_p3 = scmp.lt.s32.totalorder %s2724_s2, %s2724_s2 }
  0x28   :  { %p2731_p4 = por %p2730_p3, %p2729_p2 }
  0x2a   :  { %p2732_p5 = pnand %p2731_p4, %p2725_p1 }
  0x2c   :  { %2735 = shalt.err (!%p2732_p5)
}
  0x2d   :  { %s2750_s13 = smov 64   ;;  %s2751_s14 = smov 4  }
  0x2e   :  { %76 = dma.hbm_to_vmem [thread:$0]  %s2881_s8, 2048, %s71_s12, [#allocation9], %s2750_s13, %s2750_s13, %s2751_s14  }
  0x2f   :  { %2736 = dma.done.wait [#allocation4], 4096  }
  0x30   :  { %2737 = vsyncadd [#allocation4], 4294963200 }
  0x31   :  { %2738 = dma.done.wait [#allocation6], 24576  }
  0x32   :  { %2739 = vsyncadd [#allocation6], 4294942720 }
  0x33   :  { %2740 = dma.done.wait [#allocation9], 2048  }
  0x34   :  { %2741 = vsyncadd [#allocation9], 4294965248  ;;  %v2752_v0 = vmov 0   ;;  %v2302_v1 = vld [vmem:[#allocation3 + $0xe4] ss:$16 sps:$4 sm:$0xff]  }
  0x35   :  { %340 = vmatprep.mubr.bf16.mxu0 %v2752_v0  ;;  %381 = vmatprep.mubr.bf16.mxu1 %v2752_v0  ;;  %v2304_v2 = vld [vmem:[#allocation3 + $0xec] ss:$16 sps:$4 sm:$0xff]   ;;  %v2306_v3 = vld [vmem:[#allocation3 + $0xe0] ss:$16 sps:$4 sm:$0xff]   ;;  %v2307_v4 = vld [vmem:[#allocation3 + $0xe8] ss:$16 sps:$4 sm:$0xff]  }
  0x36   :  { %308 = vmatprep.subr.bf16.mxu0 %v2302_v1  ;;  %349 = vmatprep.subr.bf16.mxu1 %v2304_v2  ;;  %v2308_v5 = vld [vmem:[#allocation3 + $0xc4] ss:$16 sps:$4 sm:$0xff]   ;;  %v2310_v6 = vld [vmem:[#allocation3 + $0xcc] ss:$16 sps:$4 sm:$0xff]   ;;  %v2312_v7 = vld [vmem:[#allocation3 + $0xc0] ss:$16 sps:$4 sm:$0xff]  }
  0x37   :  { %309 = vmatpush1.bf16.msra.mxu0 %v2306_v3  ;;  %350 = vmatpush1.bf16.msra.mxu1 %v2307_v4  ;;  %v2313_v8 = vld [vmem:[#allocation3 + $0xc8] ss:$16 sps:$4 sm:$0xff]   ;;  %v2314_v9 = vld [vmem:[#allocation3 + $0xa4] ss:$16 sps:$4 sm:$0xff]   ;;  %v2316_v10 = vld [vmem:[#allocation3 + $0xac] ss:$16 sps:$4 sm:$0xff]  }
  0x38   :  { %310 = vmatprep.subr.bf16.mxu0 %v2308_v5  ;;  %351 = vmatprep.subr.bf16.mxu1 %v2310_v6  ;;  %v2318_v11 = vld [vmem:[#allocation3 + $0xa0] ss:$16 sps:$4 sm:$0xff]   ;;  %v2319_v12 = vld [vmem:[#allocation3 + $0xa8] ss:$16 sps:$4 sm:$0xff]   ;;  %v2320_v13 = vld [vmem:[#allocation3 + $0x84] ss:$16 sps:$4 sm:$0xff]  }
  0x39   :  { %v2322_v14 = vld [vmem:[#allocation3 + $0x8c] ss:$16 sps:$4 sm:$0xff]   ;;  %v2324_v15 = vld [vmem:[#allocation3 + $0x80] ss:$16 sps:$4 sm:$0xff]   ;;  %v2325_v16 = vld [vmem:[#allocation3 + $0x88] ss:$16 sps:$4 sm:$0xff]  }
  0x3a   :  { %v2326_v17 = vld [vmem:[#allocation3 + $0x64] ss:$16 sps:$4 sm:$0xff]   ;;  %v2328_v18 = vld [vmem:[#allocation3 + $0x6c] ss:$16 sps:$4 sm:$0xff]   ;;  %v2330_v19 = vld [vmem:[#allocation3 + $0x60] ss:$16 sps:$4 sm:$0xff]  }
  0x3b   :  { %311 = vmatpush1.bf16.msra.mxu0 %v2312_v7  ;;  %352 = vmatpush1.bf16.msra.mxu1 %v2313_v8  ;;  %v2331_v20 = vld [vmem:[#allocation3 + $0x68] ss:$16 sps:$4 sm:$0xff]   ;;  %v2332_v21 = vld [vmem:[#allocation3 + $0x44] ss:$16 sps:$4 sm:$0xff]   ;;  %v2334_v22 = vld [vmem:[#allocation3 + $0x4c] ss:$16 sps:$4 sm:$0xff]  }
  0x3c   :  { %312 = vmatprep.subr.bf16.mxu0 %v2314_v9  ;;  %353 = vmatprep.subr.bf16.mxu1 %v2316_v10  ;;  %v2336_v23 = vld [vmem:[#allocation3 + $0x40] ss:$16 sps:$4 sm:$0xff]   ;;  %v2337_v24 = vld [vmem:[#allocation3 + $0x48] ss:$16 sps:$4 sm:$0xff]   ;;  %v2338_v25 = vld [vmem:[#allocation3 + $0x24] ss:$16 sps:$4 sm:$0xff]  }
  0x3d   :  { %v2340_v26 = vld [vmem:[#allocation3 + $0x2c] ss:$16 sps:$4 sm:$0xff]   ;;  %v2342_v27 = vld [vmem:[#allocation3 + $0x20] ss:$16 sps:$4 sm:$0xff]   ;;  %v2343_v28 = vld [vmem:[#allocation3 + $0x28] ss:$16 sps:$4 sm:$0xff]  }
  0x3e   :  { %v2344_v29 = vld [vmem:[#allocation3 + $0x4] ss:$16 sps:$4 sm:$0xff]   ;;  %v2346_v30 = vld [vmem:[#allocation3 + $0xc] ss:$16 sps:$4 sm:$0xff]   ;;  %v2348_v31 = vld [vmem:[#allocation3] ss:$16 sps:$4 sm:$0xff]  }
  0x3f   :  { %313 = vmatpush1.bf16.msra.mxu0 %v2318_v11  ;;  %354 = vmatpush1.bf16.msra.mxu1 %v2319_v12  ;;  %v2349_v32 = vld [vmem:[#allocation3 + $0x8] ss:$16 sps:$4 sm:$0xff]   ;;  %v2352_v33 = vld [vmem:[#allocation5 + $0xe4] ss:$16 sps:$4 sm:$0xff]   ;;  %v93_v35 = vld [vmem:[%s2874_s1] sm:$0xf] }
  0x40   :  { %314 = vmatprep.subr.bf16.mxu0 %v2320_v13  ;;  %355 = vmatprep.subr.bf16.mxu1 %v2322_v14  ;;  %v2355_v34 = vld [vmem:[#allocation5 + $0x2e4] ss:$16 sps:$4 sm:$0xff]   ;;  %v2350_v36 = vld [vmem:[#allocation5 + $0xe0] ss:$16 sps:$4 sm:$0xff]  }
  0x41   :  { %v2353_v37 = vld [vmem:[#allocation5 + $0x2e0] ss:$16 sps:$4 sm:$0xff]   ;;  %v2358_v38 = vld [vmem:[#allocation5 + $0xc4] ss:$16 sps:$4 sm:$0xff]  }
  0x42   :  { %v2361_v39 = vld [vmem:[#allocation5 + $0x2c4] ss:$16 sps:$4 sm:$0xff]   ;;  %v2356_v40 = vld [vmem:[#allocation5 + $0xc0] ss:$16 sps:$4 sm:$0xff]  }
  0x43   :  { %315 = vmatpush1.bf16.msra.mxu0 %v2324_v15  ;;  %356 = vmatpush1.bf16.msra.mxu1 %v2325_v16  ;;  %v2359_v41 = vld [vmem:[#allocation5 + $0x2c0] ss:$16 sps:$4 sm:$0xff]   ;;  %v2364_v42 = vld [vmem:[#allocation5 + $0xa4] ss:$16 sps:$4 sm:$0xff]  }
  0x44   :  { %316 = vmatprep.subr.bf16.mxu0 %v2326_v17  ;;  %357 = vmatprep.subr.bf16.mxu1 %v2328_v18  ;;  %v2367_v43 = vld [vmem:[#allocation5 + $0x2a4] ss:$16 sps:$4 sm:$0xff]   ;;  %v2362_v44 = vld [vmem:[#allocation5 + $0xa0] ss:$16 sps:$4 sm:$0xff]  }
  0x45   :  { %v2365_v45 = vld [vmem:[#allocation5 + $0x2a0] ss:$16 sps:$4 sm:$0xff]   ;;  %v2370_v46 = vld [vmem:[#allocation5 + $0x84] ss:$16 sps:$4 sm:$0xff]  }
  0x46   :  { %v2373_v47 = vld [vmem:[#allocation5 + $0x284] ss:$16 sps:$4 sm:$0xff]   ;;  %v2368_v48 = vld [vmem:[#allocation5 + $0x80] ss:$16 sps:$4 sm:$0xff]  }
  0x47   :  { %317 = vmatpush1.bf16.msra.mxu0 %v2330_v19  ;;  %358 = vmatpush1.bf16.msra.mxu1 %v2331_v20  ;;  %v2371_v49 = vld [vmem:[#allocation5 + $0x280] ss:$16 sps:$4 sm:$0xff]   ;;  %v2376_v50 = vld [vmem:[#allocation5 + $0x64] ss:$16 sps:$4 sm:$0xff]  }
  0x48   :  { %318 = vmatprep.subr.bf16.mxu0 %v2332_v21  ;;  %359 = vmatprep.subr.bf16.mxu1 %v2334_v22  ;;  %v2379_v51 = vld [vmem:[#allocation5 + $0x264] ss:$16 sps:$4 sm:$0xff]   ;;  %v2374_v52 = vld [vmem:[#allocation5 + $0x60] ss:$16 sps:$4 sm:$0xff]  }
  0x49   :  { %v2377_v53 = vld [vmem:[#allocation5 + $0x260] ss:$16 sps:$4 sm:$0xff]   ;;  %v2382_v54 = vld [vmem:[#allocation5 + $0x44] ss:$16 sps:$4 sm:$0xff]  }
  0x4a   :  { %v2385_v55 = vld [vmem:[#allocation5 + $0x244] ss:$16 sps:$4 sm:$0xff]   ;;  %v2380_v56 = vld [vmem:[#allocation5 + $0x40] ss:$16 sps:$4 sm:$0xff]  }
  0x4b   :  { %319 = vmatpush1.bf16.msra.mxu0 %v2336_v23  ;;  %360 = vmatpush1.bf16.msra.mxu1 %v2337_v24  ;;  %v2383_v57 = vld [vmem:[#allocation5 + $0x240] ss:$16 sps:$4 sm:$0xff]   ;;  %v2388_v58 = vld [vmem:[#allocation5 + $0x24] ss:$16 sps:$4 sm:$0xff]  }
  0x4c   :  { %320 = vmatprep.subr.bf16.mxu0 %v2338_v25  ;;  %361 = vmatprep.subr.bf16.mxu1 %v2340_v26  ;;  %v2391_v59 = vld [vmem:[#allocation5 + $0x224] ss:$16 sps:$4 sm:$0xff]   ;;  %v2386_v60 = vld [vmem:[#allocation5 + $0x20] ss:$16 sps:$4 sm:$0xff]  }
  0x4d   :  { %v2389_v61 = vld [vmem:[#allocation5 + $0x220] ss:$16 sps:$4 sm:$0xff]   ;;  %v2394_v62 = vld [vmem:[#allocation5 + $0x4] ss:$16 sps:$4 sm:$0xff]  }
  0x4e   :  { %v2397_v63 = vld [vmem:[#allocation5 + $0x204] ss:$16 sps:$4 sm:$0xff]   ;;  %v2392_v0 = vld [vmem:[#allocation5] ss:$16 sps:$4 sm:$0xff]  }
  0x4f   :  { %321 = vmatpush1.bf16.msra.mxu0 %v2342_v27  ;;  %362 = vmatpush1.bf16.msra.mxu1 %v2343_v28  ;;  %v2395_v1 = vld [vmem:[#allocation5 + $0x200] ss:$16 sps:$4 sm:$0xff]   ;;  %v2400_v2 = vld [vmem:[#allocation5 + $0x1e4] ss:$16 sps:$4 sm:$0xff]  }
  0x50   :  { %322 = vmatprep.subr.bf16.mxu0 %v2344_v29  ;;  %363 = vmatprep.subr.bf16.mxu1 %v2346_v30  ;;  %v2403_v3 = vld [vmem:[#allocation5 + $0x3e4] ss:$16 sps:$4 sm:$0xff]   ;;  %v2398_v4 = vld [vmem:[#allocation5 + $0x1e0] ss:$16 sps:$4 sm:$0xff]  }
  0x51   :  { %v2401_v5 = vld [vmem:[#allocation5 + $0x3e0] ss:$16 sps:$4 sm:$0xff]   ;;  %v2406_v6 = vld [vmem:[#allocation5 + $0x1c4] ss:$16 sps:$4 sm:$0xff]  }
  0x52   :  { %v2409_v7 = vld [vmem:[#allocation5 + $0x3c4] ss:$16 sps:$4 sm:$0xff]   ;;  %v2404_v8 = vld [vmem:[#allocation5 + $0x1c0] ss:$16 sps:$4 sm:$0xff]  }
  0x53   :  { %323 = vmatpush1.bf16.msra.mxu0 %v2348_v31  ;;  %364 = vmatpush1.bf16.msra.mxu1 %v2349_v32  ;;  %v2407_v9 = vld [vmem:[#allocation5 + $0x3c0] ss:$16 sps:$4 sm:$0xff]   ;;  %v2412_v10 = vld [vmem:[#allocation5 + $0x1a4] ss:$16 sps:$4 sm:$0xff]  }
  0x54   :  { %1188 = vmatprep.subr.bf16.mxu0 %v2352_v33  ;;  %1229 = vmatprep.subr.bf16.mxu1 %v2355_v34  ;;  %v2415_v11 = vld [vmem:[#allocation5 + $0x3a4] ss:$16 sps:$4 sm:$0xff]   ;;  %v2410_v12 = vld [vmem:[#allocation5 + $0x1a0] ss:$16 sps:$4 sm:$0xff]   ;;  %v2448_v34 = vld [vmem:[#allocation5 + $0xec] ss:$16 sps:$4 sm:$0xff]  }
  0x55   :  { %v2413_v13 = vld [vmem:[#allocation5 + $0x3a0] ss:$16 sps:$4 sm:$0xff]   ;;  %v2418_v14 = vld [vmem:[#allocation5 + $0x184] ss:$16 sps:$4 sm:$0xff]  }
  0x56   :  { %341 = vmatmul.mubr.bf16.vlgmr.msra.gmra.mxu0 %v93_v35  ;;  %382 = vmatmul.mubr.bf16.vlgmr.msra.gmra.mxu1 %v93_v35  ;;  %v2421_v15 = vld [vmem:[#allocation5 + $0x384] ss:$16 sps:$4 sm:$0xff]   ;;  %v2416_v16 = vld [vmem:[#allocation5 + $0x180] ss:$16 sps:$4 sm:$0xff]   ;;  %v2451_v35 = vld [vmem:[#allocation5 + $0x2ec] ss:$16 sps:$4 sm:$0xff]  }
  0x57   :  { %1189 = vmatpush1.bf16.msra.mxu0 %v2350_v36  ;;  %1230 = vmatpush1.bf16.msra.mxu1 %v2353_v37  ;;  %v2419_v17 = vld [vmem:[#allocation5 + $0x380] ss:$16 sps:$4 sm:$0xff]   ;;  %v2424_v18 = vld [vmem:[#allocation5 + $0x164] ss:$16 sps:$4 sm:$0xff]   ;;  %v128_v36 = vlaneseq }
  0x58   :  { %1190 = vmatprep.subr.bf16.mxu0 %v2358_v38  ;;  %1231 = vmatprep.subr.bf16.mxu1 %v2361_v39  ;;  %v2427_v19 = vld [vmem:[#allocation5 + $0x364] ss:$16 sps:$4 sm:$0xff]   ;;  %v2422_v20 = vld [vmem:[#allocation5 + $0x160] ss:$16 sps:$4 sm:$0xff]  }
  0x59   :  { %v2425_v21 = vld [vmem:[#allocation5 + $0x360] ss:$16 sps:$4 sm:$0xff]   ;;  %v2430_v22 = vld [vmem:[#allocation5 + $0x144] ss:$16 sps:$4 sm:$0xff]   ;;  %v2823_v37 = vshrl.u32 %v128_v36, 7 }
  0x5a   :  { %v2433_v23 = vld [vmem:[#allocation5 + $0x344] ss:$16 sps:$4 sm:$0xff]   ;;  %v2428_v24 = vld [vmem:[#allocation5 + $0x140] ss:$16 sps:$4 sm:$0xff]   ;;  %v2497_v36 = vld [vmem:[#allocation5 + $0x3e8] ss:$16 sps:$4 sm:$0xff]  }
  0x5b   :  { %1191 = vmatpush1.bf16.msra.mxu0 %v2356_v40  ;;  %1232 = vmatpush1.bf16.msra.mxu1 %v2359_v41  ;;  %v2431_v25 = vld [vmem:[#allocation5 + $0x340] ss:$16 sps:$4 sm:$0xff]   ;;  %v2436_v26 = vld [vmem:[#allocation5 + $0x124] ss:$16 sps:$4 sm:$0xff]   ;;  %v2826_v38 = vsub.s32 0, %v2823_v37  ;;  %v138_v39 = vsub.s32 2, %v2823_v37 }
  0x5c   :  { %1192 = vmatprep.subr.bf16.mxu0 %v2364_v42  ;;  %1233 = vmatprep.subr.bf16.mxu1 %v2367_v43  ;;  %v2439_v27 = vld [vmem:[#allocation5 + $0x324] ss:$16 sps:$4 sm:$0xff]   ;;  %v2434_v28 = vld [vmem:[#allocation5 + $0x120] ss:$16 sps:$4 sm:$0xff]   ;;  %v2833_v41 = vsub.s32 1, %v2823_v37  ;;  %v142_v42 = vsub.s32 3, %v2823_v37 }
  0x5d   :  { %v2437_v29 = vld [vmem:[#allocation5 + $0x320] ss:$16 sps:$4 sm:$0xff]   ;;  %v2442_v30 = vld [vmem:[#allocation5 + $0x104] ss:$16 sps:$4 sm:$0xff]   ;;  %v2638_v37 = vld [vmem:[#allocation8 + $0x78] sm:$0xff]  }
  0x5e   :  { %v2445_v31 = vld [vmem:[#allocation5 + $0x304] ss:$16 sps:$4 sm:$0xff]   ;;  %v2440_v32 = vld [vmem:[#allocation5 + $0x100] ss:$16 sps:$4 sm:$0xff]  }
  0x5f   :  { %1193 = vmatpush1.bf16.msra.mxu0 %v2362_v44  ;;  %1234 = vmatpush1.bf16.msra.mxu1 %v2365_v45  ;;  %v2443_v33 = vld [vmem:[#allocation5 + $0x300] ss:$16 sps:$4 sm:$0xff]  }
  0x60   :  { %1194 = vmatprep.subr.bf16.mxu0 %v2370_v46  ;;  %1235 = vmatprep.subr.bf16.mxu1 %v2373_v47  ;;  %v126_v40 = vld [vmem:[%s2876_s3] sm:$0xf] }
  0x61   :  { %v131_v43 = vrot.slane %v126_v40, %v2826_v38  ;;  %v139_v44 = vrot.slane %v126_v40, %v138_v39  ;;  %v135_v45 = vrot.slane %v126_v40, %v2833_v41  ;;  %v143_v46 = vrot.slane %v126_v40, %v142_v42  ;;  %v2502_v40 = vld [vmem:[#allocation5 + $0x1cc] ss:$16 sps:$4 sm:$0xff]  }
  0x63   :  { %1195 = vmatpush1.bf16.msra.mxu0 %v2368_v48  ;;  %1236 = vmatpush1.bf16.msra.mxu1 %v2371_v49 }
  0x64   :  { %1196 = vmatprep.subr.bf16.mxu0 %v2376_v50  ;;  %1237 = vmatprep.subr.bf16.mxu1 %v2379_v51 }
  0x67   :  { %1197 = vmatpush1.bf16.msra.mxu0 %v2374_v52  ;;  %1238 = vmatpush1.bf16.msra.mxu1 %v2377_v53 }
  0x68   :  { %1198 = vmatprep.subr.bf16.mxu0 %v2382_v54  ;;  %1239 = vmatprep.subr.bf16.mxu1 %v2385_v55 }
  0x6b   :  { %1199 = vmatpush1.bf16.msra.mxu0 %v2380_v56  ;;  %1240 = vmatpush1.bf16.msra.mxu1 %v2383_v57 }
  0x6c   :  { %1200 = vmatprep.subr.bf16.mxu0 %v2388_v58  ;;  %1241 = vmatprep.subr.bf16.mxu1 %v2391_v59 }
  0x6f   :  { %1201 = vmatpush1.bf16.msra.mxu0 %v2386_v60  ;;  %1242 = vmatpush1.bf16.msra.mxu1 %v2389_v61 }
  0x70   :  { %1202 = vmatprep.subr.bf16.mxu0 %v2394_v62  ;;  %1243 = vmatprep.subr.bf16.mxu1 %v2397_v63 }
  0x73   :  { %1203 = vmatpush1.bf16.msra.mxu0 %v2392_v0  ;;  %1244 = vmatpush1.bf16.msra.mxu1 %v2395_v1 }
  0x74   :  { %1204 = vmatprep.subr.bf16.mxu0 %v2400_v2  ;;  %1245 = vmatprep.subr.bf16.mxu1 %v2403_v3  ;;  %v2446_v2 = vld [vmem:[#allocation5 + $0xe8] ss:$16 sps:$4 sm:$0xff]  }
  0x75   :  { %v2449_v3 = vld [vmem:[#allocation5 + $0x2e8] ss:$16 sps:$4 sm:$0xff]  }
  0x77   :  { %1205 = vmatpush2.bf16.msra.mxu0 %v2398_v4  ;;  %1246 = vmatpush2.bf16.msra.mxu1 %v2401_v5  ;;  %v2454_v5 = vld [vmem:[#allocation5 + $0xcc] ss:$16 sps:$4 sm:$0xff]  }
  0x78   :  { %1206 = vmatprep.subr.bf16.mxu0 %v2406_v6  ;;  %1247 = vmatprep.subr.bf16.mxu1 %v2409_v7  ;;  %v2457_v6 = vld [vmem:[#allocation5 + $0x2cc] ss:$16 sps:$4 sm:$0xff]   ;;  %v2452_v7 = vld [vmem:[#allocation5 + $0xc8] ss:$16 sps:$4 sm:$0xff]  }
  0x7b   :  { %1207 = vmatpush2.bf16.msra.mxu0 %v2404_v8  ;;  %1248 = vmatpush2.bf16.msra.mxu1 %v2407_v9  ;;  %v2455_v8 = vld [vmem:[#allocation5 + $0x2c8] ss:$16 sps:$4 sm:$0xff]   ;;  %v2460_v9 = vld [vmem:[#allocation5 + $0xac] ss:$16 sps:$4 sm:$0xff]  }
  0x7c   :  { %1208 = vmatprep.subr.bf16.mxu0 %v2412_v10  ;;  %1249 = vmatprep.subr.bf16.mxu1 %v2415_v11  ;;  %v2463_v10 = vld [vmem:[#allocation5 + $0x2ac] ss:$16 sps:$4 sm:$0xff]   ;;  %v2458_v11 = vld [vmem:[#allocation5 + $0xa8] ss:$16 sps:$4 sm:$0xff]  }
  0x7f   :  { %1209 = vmatpush2.bf16.msra.mxu0 %v2410_v12  ;;  %1250 = vmatpush2.bf16.msra.mxu1 %v2413_v13  ;;  %v2461_v12 = vld [vmem:[#allocation5 + $0x2a8] ss:$16 sps:$4 sm:$0xff]   ;;  %v2466_v13 = vld [vmem:[#allocation5 + $0x8c] ss:$16 sps:$4 sm:$0xff]  }
  0x80   :  { %1210 = vmatprep.subr.bf16.mxu0 %v2418_v14  ;;  %1251 = vmatprep.subr.bf16.mxu1 %v2421_v15  ;;  %v2469_v14 = vld [vmem:[#allocation5 + $0x28c] ss:$16 sps:$4 sm:$0xff]   ;;  %v2464_v15 = vld [vmem:[#allocation5 + $0x88] ss:$16 sps:$4 sm:$0xff]  }
  0x83   :  { %1211 = vmatpush2.bf16.msra.mxu0 %v2416_v16  ;;  %1252 = vmatpush2.bf16.msra.mxu1 %v2419_v17  ;;  %v2467_v16 = vld [vmem:[#allocation5 + $0x288] ss:$16 sps:$4 sm:$0xff]   ;;  %v2472_v17 = vld [vmem:[#allocation5 + $0x6c] ss:$16 sps:$4 sm:$0xff]  }
  0x84   :  { %1212 = vmatprep.subr.bf16.mxu0 %v2424_v18  ;;  %1253 = vmatprep.subr.bf16.mxu1 %v2427_v19  ;;  %v2475_v18 = vld [vmem:[#allocation5 + $0x26c] ss:$16 sps:$4 sm:$0xff]   ;;  %v2470_v19 = vld [vmem:[#allocation5 + $0x68] ss:$16 sps:$4 sm:$0xff]  }
  0x87   :  { %1213 = vmatpush2.bf16.msra.mxu0 %v2422_v20  ;;  %1254 = vmatpush2.bf16.msra.mxu1 %v2425_v21  ;;  %v2473_v20 = vld [vmem:[#allocation5 + $0x268] ss:$16 sps:$4 sm:$0xff]   ;;  %v2478_v21 = vld [vmem:[#allocation5 + $0x4c] ss:$16 sps:$4 sm:$0xff]  }
  0x88   :  { %1214 = vmatprep.subr.bf16.mxu0 %v2430_v22  ;;  %1255 = vmatprep.subr.bf16.mxu1 %v2433_v23  ;;  %v2481_v22 = vld [vmem:[#allocation5 + $0x24c] ss:$16 sps:$4 sm:$0xff]   ;;  %v2476_v23 = vld [vmem:[#allocation5 + $0x48] ss:$16 sps:$4 sm:$0xff]  }
  0x8b   :  { %1215 = vmatpush2.bf16.msra.mxu0 %v2428_v24  ;;  %1256 = vmatpush2.bf16.msra.mxu1 %v2431_v25  ;;  %v2479_v24 = vld [vmem:[#allocation5 + $0x248] ss:$16 sps:$4 sm:$0xff]   ;;  %v2484_v25 = vld [vmem:[#allocation5 + $0x2c] ss:$16 sps:$4 sm:$0xff]  }
  0x8c   :  { %1216 = vmatprep.subr.bf16.mxu0 %v2436_v26  ;;  %1257 = vmatprep.subr.bf16.mxu1 %v2439_v27  ;;  %v2487_v26 = vld [vmem:[#allocation5 + $0x22c] ss:$16 sps:$4 sm:$0xff]   ;;  %v2482_v27 = vld [vmem:[#allocation5 + $0x28] ss:$16 sps:$4 sm:$0xff]  }
  0x8f   :  { %1217 = vmatpush2.bf16.msra.mxu0 %v2434_v28  ;;  %1258 = vmatpush2.bf16.msra.mxu1 %v2437_v29  ;;  %v2485_v28 = vld [vmem:[#allocation5 + $0x228] ss:$16 sps:$4 sm:$0xff]   ;;  %v2490_v29 = vld [vmem:[#allocation5 + $0xc] ss:$16 sps:$4 sm:$0xff]  }
  0x90   :  { %1218 = vmatprep.subr.bf16.mxu0 %v2442_v30  ;;  %1259 = vmatprep.subr.bf16.mxu1 %v2445_v31  ;;  %v2493_v30 = vld [vmem:[#allocation5 + $0x20c] ss:$16 sps:$4 sm:$0xff]   ;;  %v2488_v31 = vld [vmem:[#allocation5 + $0x8] ss:$16 sps:$4 sm:$0xff]  }
  0x93   :  { %1219 = vmatpush2.bf16.msra.mxu0 %v2440_v32  ;;  %1260 = vmatpush2.bf16.msra.mxu1 %v2443_v33  ;;  %v2491_v32 = vld [vmem:[#allocation5 + $0x208] ss:$16 sps:$4 sm:$0xff]   ;;  %v2496_v33 = vld [vmem:[#allocation5 + $0x1ec] ss:$16 sps:$4 sm:$0xff]  }
  0x94   :  { %1270 = vmatprep.subr.bf16.mxu0 %v2448_v34  ;;  %1311 = vmatprep.subr.bf16.mxu1 %v2451_v35  ;;  %v2499_v34 = vld [vmem:[#allocation5 + $0x3ec] ss:$16 sps:$4 sm:$0xff]   ;;  %v2494_v35 = vld [vmem:[#allocation5 + $0x1e8] ss:$16 sps:$4 sm:$0xff]  }
 0x116   :  { %v342_v47 = vpop.f32.mrf.mxu0  ;;  %v383_v48 = vpop.f32.mrf.mxu1 }
 0x117   :  { %v343_v49 = vadd.f32 %v342_v47, %v131_v43  ;;  %v384_v50 = vadd.f32 %v383_v48, %v139_v44  ;;  %v2505_v43 = vld [vmem:[#allocation5 + $0x3cc] ss:$16 sps:$4 sm:$0xff]   ;;  %v2500_v44 = vld [vmem:[#allocation5 + $0x1c8] ss:$16 sps:$4 sm:$0xff]  }
 0x118   :  { %v344_v51 = vpop.f32.mrf.mxu0  ;;  %v385_v52 = vpop.f32.mrf.mxu1  ;;  %v2511_v47 = vld [vmem:[#allocation5 + $0x3ac] ss:$16 sps:$4 sm:$0xff]   ;;  %v2506_v48 = vld [vmem:[#allocation5 + $0x1a8] ss:$16 sps:$4 sm:$0xff]  }
 0x119   :  { %v392_v53 = vmax.f32 %v384_v50, 0.0  ;;  %v345_v54 = vadd.f32 %v344_v51, %v135_v45  ;;  %v386_v55 = vadd.f32 %v385_v52, %v143_v46  ;;  %v390_v56 = vmax.f32 %v343_v49, 0.0  ;;  %v2503_v45 = vld [vmem:[#allocation5 + $0x3c8] ss:$16 sps:$4 sm:$0xff]   ;;  %v2508_v46 = vld [vmem:[#allocation5 + $0x1ac] ss:$16 sps:$4 sm:$0xff]  }
 0x11a   :  { %v346_v57 = vpop.f32.mrf.mxu0  ;;  %v387_v58 = vpop.f32.mrf.mxu1  ;;  %v2509_v49 = vld [vmem:[#allocation5 + $0x3a8] ss:$16 sps:$4 sm:$0xff]   ;;  %v2514_v50 = vld [vmem:[#allocation5 + $0x18c] ss:$16 sps:$4 sm:$0xff]  }
 0x11b   :  { %v391_v59 = vmax.f32 %v345_v54, 0.0  ;;  %v393_v60 = vmax.f32 %v386_v55, 0.0  ;;  %v2842_v61 = vpack.c.bf16 %v392_v53, %v392_v53  ;;  %v2844_v4 = vpack.c.bf16 %v390_v56, %v390_v56  ;;  %v2517_v51 = vld [vmem:[#allocation5 + $0x38c] ss:$16 sps:$4 sm:$0xff]   ;;  %v2512_v52 = vld [vmem:[#allocation5 + $0x188] ss:$16 sps:$4 sm:$0xff]  }
 0x11c   :  { %v347_v62 = vpop.f32.mrf.mxu0  ;;  %v388_v63 = vpop.f32.mrf.mxu1  ;;  %v2515_v53 = vld [vmem:[#allocation5 + $0x388] ss:$16 sps:$4 sm:$0xff]   ;;  %v2520_v54 = vld [vmem:[#allocation5 + $0x16c] ss:$16 sps:$4 sm:$0xff]  }
 0x11d   :  { %v395_v0 = vpack.c.bf16 %v391_v59, %v391_v59  ;;  %v397_v1 = vpack.c.bf16 %v393_v60, %v393_v60  ;;  %v2523_v55 = vld [vmem:[#allocation5 + $0x36c] ss:$16 sps:$4 sm:$0xff]   ;;  %v2518_v56 = vld [vmem:[#allocation5 + $0x168] ss:$16 sps:$4 sm:$0xff]  }
 0x11e   :  { %v2521_v57 = vld [vmem:[#allocation5 + $0x368] ss:$16 sps:$4 sm:$0xff]   ;;  %v2526_v58 = vld [vmem:[#allocation5 + $0x14c] ss:$16 sps:$4 sm:$0xff]  }
 0x11f   :  { %1220 = vmatprep.mubr.bf16.mxu0 %v395_v0  ;;  %1261 = vmatprep.mubr.bf16.mxu1 %v397_v1  ;;  %v2529_v59 = vld [vmem:[#allocation5 + $0x34c] ss:$16 sps:$4 sm:$0xff]   ;;  %v2524_v60 = vld [vmem:[#allocation5 + $0x148] ss:$16 sps:$4 sm:$0xff]  }
 0x120   :  { %1221 = vmatmul.mubr.bf16.vlgmr.msra.gmra.mxu0 %v2844_v4  ;;  %1262 = vmatmul.mubr.bf16.vlgmr.msra.gmra.mxu1 %v2842_v61  ;;  %v2527_v62 = vld [vmem:[#allocation5 + $0x348] ss:$16 sps:$4 sm:$0xff]   ;;  %v2532_v63 = vld [vmem:[#allocation5 + $0x12c] ss:$16 sps:$4 sm:$0xff]  }
 0x121   :  { %1271 = vmatpush1.bf16.msra.mxu0 %v2446_v2  ;;  %1312 = vmatpush1.bf16.msra.mxu1 %v2449_v3  ;;  %v2533_v2 = vld [vmem:[#allocation5 + $0x328] ss:$16 sps:$4 sm:$0xff]   ;;  %v2538_v3 = vld [vmem:[#allocation5 + $0x10c] ss:$16 sps:$4 sm:$0xff]  }
 0x122   :  { %1302 = vmatprep.mubr.bf16.mxu0 %v395_v0  ;;  %1343 = vmatprep.mubr.bf16.mxu1 %v397_v1  ;;  %v2535_v0 = vld [vmem:[#allocation5 + $0x32c] ss:$16 sps:$4 sm:$0xff]   ;;  %v2530_v1 = vld [vmem:[#allocation5 + $0x128] ss:$16 sps:$4 sm:$0xff]  }
 0x123   :  { %1272 = vmatprep.subr.bf16.mxu0 %v2454_v5  ;;  %1313 = vmatprep.subr.bf16.mxu1 %v2457_v6  ;;  %v2541_v5 = vld [vmem:[#allocation5 + $0x30c] ss:$16 sps:$4 sm:$0xff]   ;;  %v2536_v6 = vld [vmem:[#allocation5 + $0x108] ss:$16 sps:$4 sm:$0xff]  }
 0x125   :  { %1273 = vmatpush1.bf16.msra.mxu0 %v2452_v7  ;;  %1314 = vmatpush1.bf16.msra.mxu1 %v2455_v8  ;;  %v2539_v7 = vld [vmem:[#allocation5 + $0x308] ss:$16 sps:$4 sm:$0xff]   ;;  %v2544_v8 = vld [vmem:[#allocation7 + $0x74] ss:$8 sps:$4 sm:$0xff]  }
 0x126   :  { %1274 = vmatprep.subr.bf16.mxu0 %v2460_v9  ;;  %1315 = vmatprep.subr.bf16.mxu1 %v2463_v10  ;;  %v2542_v9 = vld [vmem:[#allocation7 + $0x70] ss:$8 sps:$4 sm:$0xff]   ;;  %v2547_v10 = vld [vmem:[#allocation7 + $0x64] ss:$8 sps:$4 sm:$0xff]  }
 0x129   :  { %1275 = vmatpush1.bf16.msra.mxu0 %v2458_v11  ;;  %1316 = vmatpush1.bf16.msra.mxu1 %v2461_v12  ;;  %v2545_v11 = vld [vmem:[#allocation7 + $0x60] ss:$8 sps:$4 sm:$0xff]   ;;  %v2550_v12 = vld [vmem:[#allocation7 + $0x54] ss:$8 sps:$4 sm:$0xff]  }
 0x12a   :  { %1276 = vmatprep.subr.bf16.mxu0 %v2466_v13  ;;  %1317 = vmatprep.subr.bf16.mxu1 %v2469_v14  ;;  %v2548_v13 = vld [vmem:[#allocation7 + $0x50] ss:$8 sps:$4 sm:$0xff]   ;;  %v2553_v14 = vld [vmem:[#allocation7 + $0x44] ss:$8 sps:$4 sm:$0xff]  }
 0x12d   :  { %1277 = vmatpush1.bf16.msra.mxu0 %v2464_v15  ;;  %1318 = vmatpush1.bf16.msra.mxu1 %v2467_v16  ;;  %v2551_v15 = vld [vmem:[#allocation7 + $0x40] ss:$8 sps:$4 sm:$0xff]   ;;  %v2556_v16 = vld [vmem:[#allocation7 + $0x34] ss:$8 sps:$4 sm:$0xff]  }
 0x12e   :  { %1278 = vmatprep.subr.bf16.mxu0 %v2472_v17  ;;  %1319 = vmatprep.subr.bf16.mxu1 %v2475_v18  ;;  %v2592_v17 = vld [vmem:[#allocation7 + $0x174] ss:$8 sps:$4 sm:$0xff]   ;;  %v2590_v18 = vld [vmem:[#allocation7 + $0x170] ss:$8 sps:$4 sm:$0xff]  }
 0x131   :  { %1279 = vmatpush1.bf16.msra.mxu0 %v2470_v19  ;;  %1320 = vmatpush1.bf16.msra.mxu1 %v2473_v20  ;;  %v2595_v19 = vld [vmem:[#allocation7 + $0x164] ss:$8 sps:$4 sm:$0xff]  }
 0x132   :  { %1280 = vmatprep.subr.bf16.mxu0 %v2478_v21  ;;  %1321 = vmatprep.subr.bf16.mxu1 %v2481_v22  ;;  %v2559_v20 = vld [vmem:[#allocation7 + $0x24] ss:$8 sps:$4 sm:$0xff]   ;;  %v2598_v21 = vld [vmem:[#allocation7 + $0x154] ss:$8 sps:$4 sm:$0xff]   ;;  %v2557_v22 = vld [vmem:[#allocation7 + $0x20] ss:$8 sps:$4 sm:$0xff]  }
 0x135   :  { %1281 = vmatpush1.bf16.msra.mxu0 %v2476_v23  ;;  %1322 = vmatpush1.bf16.msra.mxu1 %v2479_v24  ;;  %v2596_v23 = vld [vmem:[#allocation7 + $0x150] ss:$8 sps:$4 sm:$0xff]   ;;  %v2562_v24 = vld [vmem:[#allocation7 + $0x14] ss:$8 sps:$4 sm:$0xff]  }
 0x136   :  { %1282 = vmatprep.subr.bf16.mxu0 %v2484_v25  ;;  %1323 = vmatprep.subr.bf16.mxu1 %v2487_v26  ;;  %v2601_v25 = vld [vmem:[#allocation7 + $0x144] ss:$8 sps:$4 sm:$0xff]   ;;  %v2560_v26 = vld [vmem:[#allocation7 + $0x10] ss:$8 sps:$4 sm:$0xff]  }
 0x139   :  { %1283 = vmatpush1.bf16.msra.mxu0 %v2482_v27  ;;  %1324 = vmatpush1.bf16.msra.mxu1 %v2485_v28  ;;  %v2599_v27 = vld [vmem:[#allocation7 + $0x140] ss:$8 sps:$4 sm:$0xff]   ;;  %v2565_v28 = vld [vmem:[#allocation7 + $0x4] ss:$8 sps:$4 sm:$0xff]  }
 0x13a   :  { %1284 = vmatprep.subr.bf16.mxu0 %v2490_v29  ;;  %1325 = vmatprep.subr.bf16.mxu1 %v2493_v30  ;;  %v2604_v29 = vld [vmem:[#allocation7 + $0x134] ss:$8 sps:$4 sm:$0xff]   ;;  %v2563_v30 = vld [vmem:[#allocation7] ss:$8 sps:$4 sm:$0xff]  }
 0x13d   :  { %1285 = vmatpush1.bf16.msra.mxu0 %v2488_v31  ;;  %1326 = vmatpush1.bf16.msra.mxu1 %v2491_v32  ;;  %v2602_v31 = vld [vmem:[#allocation7 + $0x130] ss:$8 sps:$4 sm:$0xff]   ;;  %v2568_v32 = vld [vmem:[#allocation7 + $0xf4] ss:$8 sps:$4 sm:$0xff]  }
 0x13e   :  { %1286 = vmatprep.subr.bf16.mxu0 %v2496_v33  ;;  %1327 = vmatprep.subr.bf16.mxu1 %v2499_v34  ;;  %v2607_v33 = vld [vmem:[#allocation7 + $0x124] ss:$8 sps:$4 sm:$0xff]   ;;  %v2566_v34 = vld [vmem:[#allocation7 + $0xf0] ss:$8 sps:$4 sm:$0xff]  }
 0x141   :  { %1287 = vmatpush2.bf16.msra.mxu0 %v2494_v35  ;;  %1328 = vmatpush2.bf16.msra.mxu1 %v2497_v36  ;;  %v2605_v35 = vld [vmem:[#allocation7 + $0x120] ss:$8 sps:$4 sm:$0xff]   ;;  %v2571_v36 = vld [vmem:[#allocation7 + $0xe4] ss:$8 sps:$4 sm:$0xff]  }
 0x142   :  { %1288 = vmatprep.subr.bf16.mxu0 %v2502_v40  ;;  %1329 = vmatprep.subr.bf16.mxu1 %v2505_v43  ;;  %v2610_v40 = vld [vmem:[#allocation7 + $0x114] ss:$8 sps:$4 sm:$0xff]   ;;  %v2569_v43 = vld [vmem:[#allocation7 + $0xe0] ss:$8 sps:$4 sm:$0xff]  }
 0x145   :  { %1289 = vmatpush2.bf16.msra.mxu0 %v2500_v44  ;;  %1330 = vmatpush2.bf16.msra.mxu1 %v2503_v45  ;;  %v2608_v44 = vld [vmem:[#allocation7 + $0x110] ss:$8 sps:$4 sm:$0xff]   ;;  %v2574_v45 = vld [vmem:[#allocation7 + $0xd4] ss:$8 sps:$4 sm:$0xff]  }
 0x146   :  { %1290 = vmatprep.subr.bf16.mxu0 %v2508_v46  ;;  %1331 = vmatprep.subr.bf16.mxu1 %v2511_v47  ;;  %v2613_v46 = vld [vmem:[#allocation7 + $0x104] ss:$8 sps:$4 sm:$0xff]   ;;  %v2572_v47 = vld [vmem:[#allocation7 + $0xd0] ss:$8 sps:$4 sm:$0xff]  }
 0x149   :  { %1291 = vmatpush2.bf16.msra.mxu0 %v2506_v48  ;;  %1332 = vmatpush2.bf16.msra.mxu1 %v2509_v49  ;;  %v2611_v48 = vld [vmem:[#allocation7 + $0x100] ss:$8 sps:$4 sm:$0xff]   ;;  %v2577_v49 = vld [vmem:[#allocation7 + $0xc4] ss:$8 sps:$4 sm:$0xff]  }
 0x14a   :  { %1292 = vmatprep.subr.bf16.mxu0 %v2514_v50  ;;  %1333 = vmatprep.subr.bf16.mxu1 %v2517_v51  ;;  %v2616_v50 = vld [vmem:[#allocation7 + $0x1f4] ss:$8 sps:$4 sm:$0xff]   ;;  %v2575_v51 = vld [vmem:[#allocation7 + $0xc0] ss:$8 sps:$4 sm:$0xff]  }
 0x14d   :  { %1293 = vmatpush2.bf16.msra.mxu0 %v2512_v52  ;;  %1334 = vmatpush2.bf16.msra.mxu1 %v2515_v53  ;;  %v2614_v52 = vld [vmem:[#allocation7 + $0x1f0] ss:$8 sps:$4 sm:$0xff]   ;;  %v2580_v53 = vld [vmem:[#allocation7 + $0xb4] ss:$8 sps:$4 sm:$0xff]  }
 0x14e   :  { %1294 = vmatprep.subr.bf16.mxu0 %v2520_v54  ;;  %1335 = vmatprep.subr.bf16.mxu1 %v2523_v55  ;;  %v2619_v54 = vld [vmem:[#allocation7 + $0x1e4] ss:$8 sps:$4 sm:$0xff]   ;;  %v2578_v55 = vld [vmem:[#allocation7 + $0xb0] ss:$8 sps:$4 sm:$0xff]  }
 0x151   :  { %1295 = vmatpush2.bf16.msra.mxu0 %v2518_v56  ;;  %1336 = vmatpush2.bf16.msra.mxu1 %v2521_v57  ;;  %v2617_v56 = vld [vmem:[#allocation7 + $0x1e0] ss:$8 sps:$4 sm:$0xff]   ;;  %v2583_v57 = vld [vmem:[#allocation7 + $0xa4] ss:$8 sps:$4 sm:$0xff]  }
 0x152   :  { %1296 = vmatprep.subr.bf16.mxu0 %v2526_v58  ;;  %1337 = vmatprep.subr.bf16.mxu1 %v2529_v59  ;;  %v2622_v58 = vld [vmem:[#allocation7 + $0x1d4] ss:$8 sps:$4 sm:$0xff]   ;;  %v2581_v59 = vld [vmem:[#allocation7 + $0xa0] ss:$8 sps:$4 sm:$0xff]  }
 0x155   :  { %1297 = vmatpush2.bf16.msra.mxu0 %v2524_v60  ;;  %1338 = vmatpush2.bf16.msra.mxu1 %v2527_v62  ;;  %v2620_v60 = vld [vmem:[#allocation7 + $0x1d0] ss:$8 sps:$4 sm:$0xff]   ;;  %v2586_v62 = vld [vmem:[#allocation7 + $0x94] ss:$8 sps:$4 sm:$0xff]  }
 0x156   :  { %1298 = vmatprep.subr.bf16.mxu0 %v2532_v63  ;;  %1339 = vmatprep.subr.bf16.mxu1 %v2535_v0  ;;  %v2625_v63 = vld [vmem:[#allocation7 + $0x1c4] ss:$8 sps:$4 sm:$0xff]   ;;  %v2584_v0 = vld [vmem:[#allocation7 + $0x90] ss:$8 sps:$4 sm:$0xff]  }
 0x159   :  { %1299 = vmatpush2.bf16.msra.mxu0 %v2530_v1  ;;  %1340 = vmatpush2.bf16.msra.mxu1 %v2533_v2  ;;  %v2623_v1 = vld [vmem:[#allocation7 + $0x1c0] ss:$8 sps:$4 sm:$0xff]   ;;  %v2589_v2 = vld [vmem:[#allocation7 + $0x84] ss:$8 sps:$4 sm:$0xff]  }
 0x15a   :  { %1300 = vmatprep.subr.bf16.mxu0 %v2538_v3  ;;  %1341 = vmatprep.subr.bf16.mxu1 %v2541_v5  ;;  %v2628_v3 = vld [vmem:[#allocation7 + $0x1b4] ss:$8 sps:$4 sm:$0xff]   ;;  %v2587_v5 = vld [vmem:[#allocation7 + $0x80] ss:$8 sps:$4 sm:$0xff]  }
 0x15d   :  { %1301 = vmatpush2.bf16.msra.mxu0 %v2536_v6  ;;  %1342 = vmatpush2.bf16.msra.mxu1 %v2539_v7  ;;  %v2626_v6 = vld [vmem:[#allocation7 + $0x1b0] ss:$8 sps:$4 sm:$0xff]   ;;  %v2631_v7 = vld [vmem:[#allocation7 + $0x1a4] ss:$8 sps:$4 sm:$0xff]  }
 0x15e   :  { %1756 = vmatprep.subr.bf16.mxu0 %v2544_v8  ;;  %1797 = vmatprep.subr.bf16.mxu1 %v2592_v17  ;;  %v2629_v8 = vld [vmem:[#allocation7 + $0x1a0] ss:$8 sps:$4 sm:$0xff]  }
 0x160   :  { %1303 = vmatmul.mubr.bf16.vlgmr.msra.gmra.mxu0 %v2844_v4  ;;  %1344 = vmatmul.mubr.bf16.vlgmr.msra.gmra.mxu1 %v2842_v61  ;;  %v2554_v4 = vld [vmem:[#allocation7 + $0x30] ss:$8 sps:$4 sm:$0xff]   ;;  %v2593_v61 = vld [vmem:[#allocation7 + $0x160] ss:$8 sps:$4 sm:$0xff]  }
 0x161   :  { %1757 = vmatpush1.bf16.msra.mxu0 %v2542_v9  ;;  %1798 = vmatpush1.bf16.msra.mxu1 %v2590_v18  ;;  %v2634_v9 = vld [vmem:[#allocation7 + $0x194] ss:$8 sps:$4 sm:$0xff]  }
 0x162   :  { %1758 = vmatprep.subr.bf16.mxu0 %v2547_v10  ;;  %1799 = vmatprep.subr.bf16.mxu1 %v2595_v19  ;;  %v2632_v10 = vld [vmem:[#allocation7 + $0x190] ss:$8 sps:$4 sm:$0xff]  }
 0x165   :  { %1759 = vmatpush1.bf16.msra.mxu0 %v2545_v11  ;;  %1800 = vmatpush1.bf16.msra.mxu1 %v2593_v61  ;;  %v2637_v11 = vld [vmem:[#allocation7 + $0x184] ss:$8 sps:$4 sm:$0xff]  }
 0x166   :  { %1760 = vmatprep.subr.bf16.mxu0 %v2550_v12  ;;  %1801 = vmatprep.subr.bf16.mxu1 %v2598_v21  ;;  %v2635_v12 = vld [vmem:[#allocation7 + $0x180] ss:$8 sps:$4 sm:$0xff]  }
 0x169   :  { %1761 = vmatpush1.bf16.msra.mxu0 %v2548_v13  ;;  %1802 = vmatpush1.bf16.msra.mxu1 %v2596_v23  ;;  %v526_v13 = vld [vmem:[%s2878_s5] sm:$0xf] }
 0x16a   :  { %1762 = vmatprep.subr.bf16.mxu0 %v2553_v14  ;;  %1803 = vmatprep.subr.bf16.mxu1 %v2601_v25  ;;  %v531_v14 = vrot.slane %v526_v13, %v2826_v38 }
 0x16d   :  { %1763 = vmatpush1.bf16.msra.mxu0 %v2551_v15  ;;  %1804 = vmatpush1.bf16.msra.mxu1 %v2599_v27  ;;  %v535_v15 = vrot.slane %v526_v13, %v2833_v41 }
 0x16e   :  { %1764 = vmatprep.subr.bf16.mxu0 %v2556_v16  ;;  %1805 = vmatprep.subr.bf16.mxu1 %v2604_v29 }
 0x171   :  { %1765 = vmatpush1.bf16.msra.mxu0 %v2554_v4  ;;  %1806 = vmatpush1.bf16.msra.mxu1 %v2602_v31  ;;  %v543_v31 = vrot.slane %v526_v13, %v142_v42  ;;  %v2640_v42 = vld [vmem:[#allocation8 + $0x70] sm:$0xff]  }
 0x172   :  { %1766 = vmatprep.subr.bf16.mxu0 %v2559_v20  ;;  %1807 = vmatprep.subr.bf16.mxu1 %v2607_v33 }
 0x175   :  { %1767 = vmatpush1.bf16.msra.mxu0 %v2557_v22  ;;  %1808 = vmatpush1.bf16.msra.mxu1 %v2605_v35 }
 0x176   :  { %1768 = vmatprep.subr.bf16.mxu0 %v2562_v24  ;;  %1809 = vmatprep.subr.bf16.mxu1 %v2610_v40 }
 0x179   :  { %1769 = vmatpush1.bf16.msra.mxu0 %v2560_v26  ;;  %1810 = vmatpush1.bf16.msra.mxu1 %v2608_v44 }
 0x17a   :  { %1770 = vmatprep.subr.bf16.mxu0 %v2565_v28  ;;  %1811 = vmatprep.subr.bf16.mxu1 %v2613_v46 }
 0x17d   :  { %1771 = vmatpush1.bf16.msra.mxu0 %v2563_v30  ;;  %1812 = vmatpush1.bf16.msra.mxu1 %v2611_v48  ;;  %v539_v30 = vrot.slane %v526_v13, %v138_v39  ;;  %v2639_v39 = vld [vmem:[#allocation8 + $0x38] sm:$0xff]  }
 0x17e   :  { %1772 = vmatprep.subr.bf16.mxu0 %v2568_v32  ;;  %1813 = vmatprep.subr.bf16.mxu1 %v2616_v50 }
 0x181   :  { %1773 = vmatpush2.bf16.msra.mxu0 %v2566_v34  ;;  %1814 = vmatpush2.bf16.msra.mxu1 %v2614_v52 }
 0x182   :  { %1774 = vmatprep.subr.bf16.mxu0 %v2571_v36  ;;  %1815 = vmatprep.subr.bf16.mxu1 %v2619_v54  ;;  %v2642_v54 = vld [vmem:[#allocation8 + $0x68] sm:$0xff]  }
 0x185   :  { %1775 = vmatpush2.bf16.msra.mxu0 %v2569_v43  ;;  %1816 = vmatpush2.bf16.msra.mxu1 %v2617_v56  ;;  %v2644_v56 = vld [vmem:[#allocation8 + $0x60] sm:$0xff]  }
 0x186   :  { %1776 = vmatprep.subr.bf16.mxu0 %v2574_v45  ;;  %1817 = vmatprep.subr.bf16.mxu1 %v2622_v58  ;;  %v2646_v58 = vld [vmem:[#allocation8 + $0x58] sm:$0xff]  }
 0x189   :  { %1777 = vmatpush2.bf16.msra.mxu0 %v2572_v47  ;;  %1818 = vmatpush2.bf16.msra.mxu1 %v2620_v60  ;;  %v2648_v60 = vld [vmem:[#allocation8 + $0x50] sm:$0xff]  }
 0x18a   :  { %1778 = vmatprep.subr.bf16.mxu0 %v2577_v49  ;;  %1819 = vmatprep.subr.bf16.mxu1 %v2625_v63  ;;  %v2650_v63 = vld [vmem:[#allocation8 + $0x48] sm:$0xff]  }
 0x18d   :  { %1779 = vmatpush2.bf16.msra.mxu0 %v2575_v51  ;;  %1820 = vmatpush2.bf16.msra.mxu1 %v2623_v1  ;;  %v2652_v1 = vld [vmem:[#allocation8 + $0x40] sm:$0xff]  }
 0x18e   :  { %1780 = vmatprep.subr.bf16.mxu0 %v2580_v53  ;;  %1821 = vmatprep.subr.bf16.mxu1 %v2628_v3  ;;  %v2641_v53 = vld [vmem:[#allocation8 + $0x30] sm:$0xff]  }
 0x191   :  { %1781 = vmatpush2.bf16.msra.mxu0 %v2578_v55  ;;  %1822 = vmatpush2.bf16.msra.mxu1 %v2626_v6  ;;  %v2643_v55 = vld [vmem:[#allocation8 + $0x28] sm:$0xff]  }
 0x192   :  { %1782 = vmatprep.subr.bf16.mxu0 %v2583_v57  ;;  %1823 = vmatprep.subr.bf16.mxu1 %v2631_v7  ;;  %v2645_v57 = vld [vmem:[#allocation8 + $0x20] sm:$0xff]  }
 0x195   :  { %1783 = vmatpush2.bf16.msra.mxu0 %v2581_v59  ;;  %1824 = vmatpush2.bf16.msra.mxu1 %v2629_v8  ;;  %v2647_v59 = vld [vmem:[#allocation8 + $0x18] sm:$0xff]   ;;  %v1424_v8 = vld [vmem:[%s2880_s7] sm:$0x3] }
 0x196   :  { %1784 = vmatprep.subr.bf16.mxu0 %v2586_v62  ;;  %1825 = vmatprep.subr.bf16.mxu1 %v2634_v9  ;;  %v2649_v62 = vld [vmem:[#allocation8 + $0x10] sm:$0xff]   ;;  %v1429_v9 = vrot.slane %v1424_v8, %v2826_v38  ;;  %v2252_v38 = vld [vmem:[%s2882_s9] ss:$0 sm:$0xff] }
 0x199   :  { %1785 = vmatpush2.bf16.msra.mxu0 %v2584_v0  ;;  %1826 = vmatpush2.bf16.msra.mxu1 %v2632_v10  ;;  %v2651_v0 = vld [vmem:[#allocation8 + $0x8] sm:$0xff]   ;;  %v1433_v10 = vrot.slane %v1424_v8, %v2833_v41 }
 0x19a   :  { %1786 = vmatprep.subr.bf16.mxu0 %v2589_v2  ;;  %1827 = vmatprep.subr.bf16.mxu1 %v2637_v11  ;;  %v2653_v2 = vld [vmem:[#allocation8] sm:$0xff]  }
 0x19d   :  { %1787 = vmatpush2.bf16.msra.mxu0 %v2587_v5  ;;  %1828 = vmatpush2.bf16.msra.mxu1 %v2635_v12 }
 0x19e   :  { %2269 = vmatprep.subr.bf16.mxu0 %v2638_v37 }
 0x1e0   :  { %v1222_v16 = vpop.f32.mrf.mxu0  ;;  %v1263_v17 = vpop.f32.mrf.mxu1 }
 0x1e1   :  { %v1223_v18 = vadd.f32 %v1222_v16, %v531_v14 }
 0x1e2   :  { %v1224_v19 = vpop.f32.mrf.mxu0  ;;  %v1265_v4 = vpop.f32.mrf.mxu1 }
 0x1e3   :  { %v1264_v61 = vadd.f32 %v1263_v17, %v1223_v18  ;;  %v1225_v20 = vadd.f32 %v1224_v19, %v535_v15 }
 0x1e4   :  { %v1226_v21 = vpop.f32.mrf.mxu0  ;;  %v1267_v22 = vpop.f32.mrf.mxu1 }
 0x1e5   :  { %v1266_v23 = vadd.f32 %v1265_v4, %v1225_v20  ;;  %v1352_v24 = vmax.f32 %v1264_v61, 0.0 }
 0x1e6   :  { %v1227_v25 = vpop.f32.mrf.mxu0  ;;  %v1268_v26 = vpop.f32.mrf.mxu1 }
 0x1e7   :  { %v1353_v27 = vmax.f32 %v1266_v23, 0.0  ;;  %v1356_v29 = vpack.c.bf16 %v1352_v24, %v1352_v24  ;;  %v2018_v26 = vstv %s2873_s0 }
 0x1e9   :  { %v1357_v28 = vpack.c.bf16 %v1353_v27, %v1353_v27 }
 0x1eb   :  { %1788 = vmatprep.mubr.bf16.mxu0 %v1357_v28 }
 0x1ec   :  { %1789 = vmatmul.mubr.bf16.vlgmr.msra.gmra.mxu0 %v1356_v29 }
 0x1ed   :  { %2270 = vmatpush3.bf16.msra.mxu0 %v2639_v39 }
 0x1ee   :  { %2271 = vmatprep.subr.bf16.mxu0 %v2640_v42 }
 0x1f1   :  { %2272 = vmatpush3.bf16.msra.mxu0 %v2641_v53 }
 0x1f2   :  { %2273 = vmatprep.subr.bf16.mxu0 %v2642_v54 }
 0x1f5   :  { %2274 = vmatpush3.bf16.msra.mxu0 %v2643_v55 }
 0x1f6   :  { %2275 = vmatprep.subr.bf16.mxu0 %v2644_v56 }
 0x1f9   :  { %2276 = vmatpush3.bf16.msra.mxu0 %v2645_v57 }
 0x1fa   :  { %2277 = vmatprep.subr.bf16.mxu0 %v2646_v58 }
 0x1fd   :  { %2278 = vmatpush3.bf16.msra.mxu0 %v2647_v59 }
 0x1fe   :  { %2279 = vmatprep.subr.bf16.mxu0 %v2648_v60 }
 0x201   :  { %2280 = vmatpush3.bf16.msra.mxu0 %v2649_v62 }
 0x202   :  { %2281 = vmatprep.subr.bf16.mxu0 %v2650_v63 }
 0x205   :  { %2282 = vmatpush3.bf16.msra.mxu0 %v2651_v0 }
 0x206   :  { %2283 = vmatprep.subr.bf16.mxu0 %v2652_v1 }
 0x209   :  { %2284 = vmatpush3.bf16.msra.mxu0 %v2653_v2 }
 0x220   :  { %v1304_v32 = vpop.f32.mrf.mxu0  ;;  %v1345_v33 = vpop.f32.mrf.mxu1 }
 0x221   :  { %v1305_v34 = vadd.f32 %v1304_v32, %v539_v30 }
 0x222   :  { %v1306_v35 = vpop.f32.mrf.mxu0  ;;  %v1347_v36 = vpop.f32.mrf.mxu1 }
 0x223   :  { %v1346_v40 = vadd.f32 %v1345_v33, %v1305_v34  ;;  %v1307_v43 = vadd.f32 %v1306_v35, %v543_v31 }
 0x224   :  { %v1308_v44 = vpop.f32.mrf.mxu0  ;;  %v1349_v45 = vpop.f32.mrf.mxu1 }
 0x225   :  { %v1348_v46 = vadd.f32 %v1347_v36, %v1307_v43  ;;  %v1354_v47 = vmax.f32 %v1346_v40, 0.0 }
 0x226   :  { %v1309_v48 = vpop.f32.mrf.mxu0  ;;  %v1350_v49 = vpop.f32.mrf.mxu1 }
 0x227   :  { %v1355_v50 = vmax.f32 %v1348_v46, 0.0  ;;  %v1358_v52 = vpack.c.bf16 %v1354_v47, %v1354_v47 }
 0x229   :  { %v1359_v51 = vpack.c.bf16 %v1355_v50, %v1355_v50 }
 0x22b   :  { %1829 = vmatprep.mubr.bf16.mxu1 %v1359_v51 }
 0x22c   :  { %1830 = vmatmul.mubr.bf16.vlgmr.msra.gmra.mxu1 %v1358_v52 }
 0x2ac   :  { %v1790_v3 = vpop.f32.mrf.mxu0 }
 0x2ad   :  { %v1791_v11 = vadd.f32 %v1790_v3, %v1429_v9 }
 0x2ae   :  { %v1792_v5 = vpop.f32.mrf.mxu0 }
 0x2af   :  { %v1793_v13 = vadd.f32 %v1792_v5, %v1433_v10 }
 0x2b0   :  { %v1794_v6 = vpop.f32.mrf.mxu0 }
 0x2b2   :  { %v1795_v7 = vpop.f32.mrf.mxu0 }
 0x2ec   :  { %v1831_v12 = vpop.f32.mrf.mxu1 }
 0x2ed   :  { %v1832_v14 = vadd.f32 %v1831_v12, %v1791_v11 }
 0x2ee   :  { %v1833_v15 = vpop.f32.mrf.mxu1 }
 0x2ef   :  { %v1834_v16 = vadd.f32 %v1833_v15, %v1793_v13  ;;  %v1838_v17 = vmax.f32 %v1832_v14, 0.0 }
 0x2f0   :  { %v1835_v18 = vpop.f32.mrf.mxu1 }
 0x2f1   :  { %v1839_v19 = vmax.f32 %v1834_v16, 0.0  ;;  %v1840_v20 = vpack.c.bf16 %v1838_v17, %v1838_v17 }
 0x2f2   :  { %v1836_v4 = vpop.f32.mrf.mxu1 }
 0x2f3   :  { %v1841_v61 = vpack.c.bf16 %v1839_v19, %v1839_v19 }
 0x2f5   :  { %2009 = vmatprep.mubr.bf16.mxu0 %v1841_v61 }
 0x2f6   :  { %2010 = vmatmul.mubr.bf16.vlgmr.msra.gmra.mxu0 %v1840_v20 }
 0x3b6   :  { %v2285_v21 = vpop.f32.mrf.mxu0 }
 0x3b8   :  { %v2286_v41 = vpop.f32.mrf.mxu0 }
 0x3b9   :  { %v2287_v22 = vadd.f32 %v2286_v41, %v2285_v21 }
 0x3ba   :  { %v2288_v23 = vpop.f32.mrf.mxu0 }
 0x3bb   :  { %v2012_v24 = vadd.f32 %v2287_v22, %v2252_v38 }
 0x3bc   :  { %v2289_v25 = vpop.f32.mrf.mxu0 }
 0x3bd   :  { %2654 = vtanh.f32 %v2012_v24 }
 0x3ca   :  { %v2655_v27 = vpop.eup %2654 }
 0x3cb   :  { %v2019_v28 = vmul.f32 %v2655_v27, %v2018_v26 }
 0x3cd   :  { %2020 = vst [vmem:[%s2883_s10] sm:$0xff] %v2019_v28 }
 0x3ce   :  { %2025 = vsyncpa [#allocation4], 1 }
 0x3cf   :  { %2026 = vsyncpa [#allocation6], 1 }
 0x3d0   :  { %2027 = vsyncpa [#allocation9], 1 }

</bundles_post_ra>
